<compile_context>
chip_gen: v5e
topology: v5e:2x2
jax: 0.10.0
libtpu: 0.0.40
codegen_flags: <defaults>
</compile_context>

<pallas_src>
import functools

import jax
import jax.numpy as jnp
from jax.experimental import pallas as pl
from jax.experimental.pallas import tpu as pltpu


def _round_up(n: int, m: int) -> int:
    return (n + m - 1) // m * m


def _vmem_capacity_bytes() -> int:
    """Physical per-core VMEM; conservative fallback (v7x) if query fails."""
    try:
        return int(pltpu.get_tpu_info().vmem_capacity_bytes)
    except Exception:  # pragma: no cover - e.g. interpret mode / CPU tracing
        return 64 << 20


def _compiler_params(vmem_need: int, dimension_semantics, phys: int):
    cap = (phys * 3) // 4                       # keep ~25% headroom below HW
    limit = min(max(int(vmem_need * 5 // 4), 16 << 20), cap)
    return pltpu.CompilerParams(dimension_semantics=dimension_semantics,
                                vmem_limit_bytes=limit)


# --------------------------------------------------------------------------
# Kernels
# --------------------------------------------------------------------------
def _ae_fused_kernel(x_ref, we_ref, be_ref, wd_ref, bd_ref, o_ref):
    """relu(x @ We + be) @ Wd[:, col_block] + bd[col_block].

    x arrives as f32 and is cast to bf16 in-kernel (saves a wrapper-side HBM
    round trip); both matmuls accumulate in f32 on the MXU."""
    x = x_ref[...].astype(jnp.bfloat16)                                  # (TB, Dp)
    h = jnp.dot(x, we_ref[...], preferred_element_type=jnp.float32)     # (TB, Hp)
    h = jnp.maximum(h + be_ref[...], 0.0)
    y = jnp.dot(h.astype(jnp.bfloat16), wd_ref[...],
                preferred_element_type=jnp.float32)                     # (TB, TDN)
    o_ref[...] = (y + bd_ref[...]).astype(o_ref.dtype)


def _enc_kernel(x_ref, we_ref, be_ref, h_ref, acc_ref):
    """Encoder with the feature dim tiled over the (last, 'arbitrary') grid
    axis; partial products accumulate into a resident f32 scratch."""
    k = pl.program_id(1)

    @pl.when(k == 0)
    def _():
        acc_ref[...] = jnp.zeros_like(acc_ref)

    acc_ref[...] += jnp.dot(x_ref[...].astype(jnp.bfloat16), we_ref[...],
                            preferred_element_type=jnp.float32)

    @pl.when(k == pl.num_programs(1) - 1)
    def _():
        h_ref[...] = jnp.maximum(acc_ref[...] + be_ref[...], 0.0).astype(h_ref.dtype)


def _dec_kernel(h_ref, wd_ref, bd_ref, o_ref):
    """Decoder tiled over output columns (both grid axes parallel)."""
    y = jnp.dot(h_ref[...], wd_ref[...], preferred_element_type=jnp.float32)
    o_ref[...] = (y + bd_ref[...]).astype(o_ref.dtype)


# --------------------------------------------------------------------------
# Wrapper
# --------------------------------------------------------------------------
def _pick_batch_tile(B: int, requested: int):
    """Batch tile multiple of 16 (bf16 sublane packing), bounded padding waste."""
    bp16 = _round_up(B, 16)
    tb = min(_round_up(requested, 16), bp16)
    while tb > 16 and (_round_up(bp16, tb) - B) * 8 > B:   # >12.5% dead rows
        tb = max(16, _round_up(tb // 2, 16))
    return tb, _round_up(bp16, tb)


@functools.partial(jax.jit,
                   static_argnames=("batch_tile", "out_dtype", "force_tiled"))
def encoder_decoder_forward(x_nchw, w_enc, b_enc, w_dec, b_dec, *,
                            batch_tile: int = 512,
                            out_dtype=jnp.float32,
                            force_tiled: bool = False):
    """x_nchw: (B, C, H, W) float32. Returns reconstruction of same shape."""
    B, C, Hs, Ws = x_nchw.shape
    D = C * Hs * Ws
    Hd = w_enc.shape[1]
    assert w_enc.shape == (D, Hd)
    assert w_dec.shape == (Hd, D)

    TB, Bp = _pick_batch_tile(B, batch_tile)
    Hp = _round_up(Hd, 128)
    phys = _vmem_capacity_bytes()
    out_bytes = jnp.dtype(out_dtype).itemsize

    # Resident-weight footprint of the fused single-call path.
    Dp_small = _round_up(D, 128)
    resident_need = (2 * TB * Dp_small * 4            # x tiles (f32, 2 buffers)
                     + 2 * TB * Dp_small * out_bytes  # out tiles (2 buffers)
                     + 2 * Dp_small * Hp * 2          # both bf16 weight blocks
                     + TB * Hp * 4                    # intermediate h
                     + (Hp + Dp_small) * 4)           # biases
    use_tiled = force_tiled or resident_need > (phys // 2)

    x2 = x_nchw.reshape(B, D)

    if not use_tiled:
        # ---------------- fused, weights resident in VMEM ----------------
        Dp = Dp_small
        # Split decoder columns when the batch grid has a single step so both
        # v7x TensorCores get work; harmless elsewhere.
        n_col = 2 if (Bp // TB) < 2 and Dp % 256 == 0 else 1
        TDN = Dp // n_col

        if (Bp, Dp) != (B, D):
            x2 = jnp.pad(x2, ((0, Bp - B), (0, Dp - D)))
        we = w_enc.astype(jnp.bfloat16)
        wd = w_dec.astype(jnp.bfloat16)
        if Dp != D or Hp != Hd:
            we = jnp.pad(we, ((0, Dp - D), (0, Hp - Hd)))
            wd = jnp.pad(wd, ((0, Hp - Hd), (0, Dp - D)))
        be = jnp.pad(b_enc.astype(jnp.float32), (0, Hp - Hd)).reshape(1, Hp)
        bd = jnp.pad(b_dec.astype(jnp.float32), (0, Dp - D)).reshape(1, Dp)

        cost = pl.CostEstimate(
            flops=2 * Bp * Dp * Hp * (n_col + 1),
            transcendentals=0,
            bytes_accessed=(Bp * Dp * 4 + 2 * Dp * Hp * 2
                            + (Hp + Dp) * 4 + Bp * Dp * out_bytes))

        out_padded = pl.pallas_call(
            _ae_fused_kernel,
            out_shape=jax.ShapeDtypeStruct((Bp, Dp), out_dtype),
            grid=(Bp // TB, n_col),
            in_specs=[
                pl.BlockSpec((TB, Dp), lambda i, j: (i, 0)),   # x tile (f32)
                pl.BlockSpec((Dp, Hp), lambda i, j: (0, 0)),   # W_enc (resident)
                pl.BlockSpec((1, Hp),  lambda i, j: (0, 0)),   # b_enc
                pl.BlockSpec((Hp, TDN), lambda i, j: (0, j)),  # W_dec col block
                pl.BlockSpec((1, TDN),  lambda i, j: (0, j)),  # b_dec col block
            ],
            out_specs=pl.BlockSpec((TB, TDN), lambda i, j: (i, j)),
            compiler_params=_compiler_params(
                resident_need, ("parallel", "parallel"), phys),
            cost_estimate=cost,
        )(x2, we, be, wd, bd)

    else:
        # -------- feature-dim tiled path (large D / small VMEM) ----------
        FT = 512                                   # feature chunk (lane-dense)
        Dp = _round_up(D, FT)

        if (Bp, Dp) != (B, D):
            x2 = jnp.pad(x2, ((0, Bp - B), (0, Dp - D)))
        we = jnp.pad(w_enc, ((0, Dp - D), (0, Hp - Hd))).astype(jnp.bfloat16)
        wd = jnp.pad(w_dec, ((0, Hp - Hd), (0, Dp - D))).astype(jnp.bfloat16)
        be = jnp.pad(b_enc.astype(jnp.float32), (0, Hp - Hd)).reshape(1, Hp)
        bd = jnp.pad(b_dec.astype(jnp.float32), (0, Dp - D)).reshape(1, Dp)

        # Encoder: grid (batch, k) with k = feature chunks (reduction, last).
        enc_need = (2 * TB * FT * 4 + 2 * FT * Hp * 2 + 2 * TB * Hp * 2
                    + TB * Hp * 4 + Hp * 4)
        h = pl.pallas_call(
            _enc_kernel,
            out_shape=jax.ShapeDtypeStruct((Bp, Hp), jnp.bfloat16),
            grid=(Bp // TB, Dp // FT),
            in_specs=[
                pl.BlockSpec((TB, FT), lambda i, k: (i, k)),
                pl.BlockSpec((FT, Hp), lambda i, k: (k, 0)),
                pl.BlockSpec((1, Hp),  lambda i, k: (0, 0)),
            ],
            out_specs=pl.BlockSpec((TB, Hp), lambda i, k: (i, 0)),
            scratch_shapes=[pltpu.VMEM((TB, Hp), jnp.float32)],
            compiler_params=_compiler_params(
                enc_need, ("parallel", "arbitrary"), phys),
            cost_estimate=pl.CostEstimate(
                flops=2 * Bp * Dp * Hp, transcendentals=0,
                bytes_accessed=Bp * Dp * 4 + Dp * Hp * 2 + Bp * Hp * 2),
        )(x2, we, be)

        # Decoder: grid (batch, output-column blocks), both parallel.
        dec_need = (2 * TB * Hp * 2 + 2 * Hp * FT * 2
                    + 2 * TB * FT * out_bytes + FT * 4)
        out_padded = pl.pallas_call(
            _dec_kernel,
            out_shape=jax.ShapeDtypeStruct((Bp, Dp), out_dtype),
            grid=(Bp // TB, Dp // FT),
            in_specs=[
                pl.BlockSpec((TB, Hp), lambda i, j: (i, 0)),
                pl.BlockSpec((Hp, FT), lambda i, j: (0, j)),
                pl.BlockSpec((1, FT),  lambda i, j: (0, j)),
            ],
            out_specs=pl.BlockSpec((TB, FT), lambda i, j: (i, j)),
            compiler_params=_compiler_params(
                dec_need, ("parallel", "parallel"), phys),
            cost_estimate=pl.CostEstimate(
                flops=2 * Bp * Hp * Dp, transcendentals=0,
                bytes_accessed=Bp * Hp * 2 + Hp * Dp * 2 + Bp * Dp * out_bytes),
        )(h, wd, bd)

    if (Bp, Dp) != (B, D):
        out_padded = out_padded[:B, :D]
    return out_padded.reshape(B, C, Hs, Ws)


# --------------------------------------------------------------------------
# Parameter init + references
# --------------------------------------------------------------------------
def init_params(key, D, Hd, dtype=jnp.float32):
    """Deterministic PyTorch-Linear-style init: U(-1/sqrt(fan_in), +1/sqrt(fan_in))."""
    k1, k2, k3, k4 = jax.random.split(key, 4)
    lim_e = 1.0 / jnp.sqrt(D)
    lim_d = 1.0 / jnp.sqrt(Hd)
    w_enc = jax.random.uniform(k1, (D, Hd), dtype, minval=-lim_e, maxval=lim_e)
    b_enc = jax.random.uniform(k2, (Hd,), dtype, minval=-lim_e, maxval=lim_e)
    w_dec = jax.random.uniform(k3, (Hd, D), dtype, minval=-lim_d, maxval=lim_d)
    b_dec = jax.random.uniform(k4, (D,), dtype, minval=-lim_d, maxval=lim_d)
    return w_enc, b_enc, w_dec, b_dec


def reference_forward_f32(x_nchw, w_enc, b_enc, w_dec, b_dec):
    """Pure-JAX f32 reference mirroring the PyTorch forward."""
    B = x_nchw.shape[0]
    x2 = x_nchw.reshape(B, -1)
    h = jnp.maximum(x2 @ w_enc + b_enc, 0.0)
    y = h @ w_dec + b_dec
    return y.reshape(x_nchw.shape)


def reference_forward_bf16(x_nchw, w_enc, b_enc, w_dec, b_dec):
    """Pure-JAX reference with the same bf16-operand / f32-accumulate policy."""
    B = x_nchw.shape[0]
    x2 = x_nchw.reshape(B, -1).astype(jnp.bfloat16)
    h = jnp.dot(x2, w_enc.astype(jnp.bfloat16),
                preferred_element_type=jnp.float32) + b_enc
    h = jnp.maximum(h, 0.0)
    y = jnp.dot(h.astype(jnp.bfloat16), w_dec.astype(jnp.bfloat16),
                preferred_element_type=jnp.float32) + b_dec
    return y.reshape(x_nchw.shape)


if __name__ == "__main__":
    # Small shapes consistent with the module: batch=2, channels=4, spatial=16.
    B, C, Hs, Ws = 2, 4, 16, 16
    hidden = 32
    D = C * Hs * Ws

    key = jax.random.PRNGKey(0)
    kx, kp = jax.random.split(key)
    x = jax.random.normal(kx, (B, C, Hs, Ws), jnp.float32)
    w_enc, b_enc, w_dec, b_dec = init_params(kp, D, hidden)

    ref16 = reference_forward_bf16(x, w_enc, b_enc, w_dec, b_dec)
    ref32 = reference_forward_f32(x, w_enc, b_enc, w_dec, b_dec)

    # Default path (fused, resident weights, f32 output).
    out = jax.block_until_ready(
        encoder_decoder_forward(x, w_enc, b_enc, w_dec, b_dec))
    assert out.shape == (B, C, Hs, Ws) and out.dtype == jnp.float32
    assert jnp.allclose(out, ref16, atol=2e-3, rtol=2e-3)
    assert jnp.allclose(out, ref32, atol=5e-2, rtol=5e-2)

    # D-tiled two-kernel path (chosen automatically when resident weights
    # would overflow VMEM, e.g. image-scale D on v7x); exercised explicitly.
    out_t = jax.block_until_ready(
        encoder_decoder_forward(x, w_enc, b_enc, w_dec, b_dec, force_tiled=True))
    assert jnp.allclose(out_t, ref16, atol=2e-3, rtol=2e-3)

    # bf16 output variant (halves the dominant HBM write stream).
    out_bf = jax.block_until_ready(
        encoder_decoder_forward(x, w_enc, b_enc, w_dec, b_dec,
                                out_dtype=jnp.bfloat16))
    assert out_bf.dtype == jnp.bfloat16
    assert jnp.allclose(out_bf.astype(jnp.float32), ref16, atol=2e-2, rtol=2e-2)

    print("KERNEL_OK")
</pallas_src>

<mosaic_0001>
module attributes {stable_mosaic.version = 11 : i64} {
  func.func @_ae_fused_kernel(%arg0: i32, %arg1: i32, %arg2: memref<16x1024xf32, #tpu.memory_space<vmem>>, %arg3: memref<1024x128xbf16, #tpu.memory_space<vmem>>, %arg4: memref<1x128xf32, #tpu.memory_space<vmem>>, %arg5: memref<128x512xbf16, #tpu.memory_space<vmem>>, %arg6: memref<1x512xf32, #tpu.memory_space<vmem>>, %arg7: memref<16x512xf32, #tpu.memory_space<vmem>>) attributes {dimension_semantics = [#tpu.dimension_semantics<parallel>, #tpu.dimension_semantics<parallel>], iteration_bounds = array<i64: 1, 2>, scalar_prefetch = 0 : i64, scratch_operands = 0 : i64, tpu.core_type = #tpu.core_type<tc>, window_params = [{transform_indices = @transform_0, window_bounds = array<i64: 16, 1024>}, {pipeline_mode = #tpu.pipeline_mode<synchronous>, transform_indices = @transform_1, window_bounds = array<i64: 1024, 128>}, {pipeline_mode = #tpu.pipeline_mode<synchronous>, transform_indices = @transform_2, window_bounds = array<i64: 1, 128>}, {transform_indices = @transform_3, window_bounds = array<i64: 128, 512>}, {transform_indices = @transform_4, window_bounds = array<i64: 1, 512>}, {transform_indices = @transform_5, window_bounds = array<i64: 16, 512>}]} {
    %c0 = arith.constant 0 : index
    %c0_0 = arith.constant 0 : index
    %0 = vector.load %arg2[%c0, %c0_0] : memref<16x1024xf32, #tpu.memory_space<vmem>>, vector<16x1024xf32>
    %1 = arith.truncf %0 : vector<16x1024xf32> to vector<16x1024xbf16>
    %c0_1 = arith.constant 0 : index
    %c0_2 = arith.constant 0 : index
    %2 = vector.load %arg3[%c0_1, %c0_2] : memref<1024x128xbf16, #tpu.memory_space<vmem>>, vector<1024x128xbf16>
    %cst = arith.constant dense<0.000000e+00> : vector<16x128xf32>
    %3 = tpu.matmul %1, %2, %cst {dimension_numbers = #tpu.dot_dimension_numbers<[1], [0], [0], [1], [0, 0, 1, 1], [], []>} : vector<16x1024xbf16>, vector<1024x128xbf16>, vector<16x128xf32> -> vector<16x128xf32>
    %c0_3 = arith.constant 0 : index
    %c0_4 = arith.constant 0 : index
    %4 = vector.load %arg4[%c0_3, %c0_4] : memref<1x128xf32, #tpu.memory_space<vmem>>, vector<1x128xf32>
    %5 = vector.broadcast %4 : vector<1x128xf32> to vector<16x128xf32>
    %6 = arith.addf %3, %5 : vector<16x128xf32>
    %cst_5 = arith.constant 0.000000e+00 : f32
    %7 = vector.broadcast %cst_5 : f32 to vector<16x128xf32>
    %8 = arith.maximumf %6, %7 : vector<16x128xf32>
    %9 = arith.truncf %8 : vector<16x128xf32> to vector<16x128xbf16>
    %c0_6 = arith.constant 0 : index
    %c0_7 = arith.constant 0 : index
    %10 = vector.load %arg5[%c0_6, %c0_7] : memref<128x512xbf16, #tpu.memory_space<vmem>>, vector<128x512xbf16>
    %cst_8 = arith.constant dense<0.000000e+00> : vector<16x512xf32>
    %11 = tpu.matmul %9, %10, %cst_8 {dimension_numbers = #tpu.dot_dimension_numbers<[1], [0], [0], [1], [0, 0, 1, 1], [], []>} : vector<16x128xbf16>, vector<128x512xbf16>, vector<16x512xf32> -> vector<16x512xf32>
    %c0_9 = arith.constant 0 : index
    %c0_10 = arith.constant 0 : index
    %12 = vector.load %arg6[%c0_9, %c0_10] : memref<1x512xf32, #tpu.memory_space<vmem>>, vector<1x512xf32>
    %13 = vector.broadcast %12 : vector<1x512xf32> to vector<16x512xf32>
    %14 = arith.addf %11, %13 : vector<16x512xf32>
    %c0_11 = arith.constant 0 : index
    %c0_12 = arith.constant 0 : index
    %15 = vector.load %arg7[%c0_11, %c0_12] : memref<16x512xf32, #tpu.memory_space<vmem>>, vector<16x512xf32>
    tpu.vector_store %arg7[%c0_11, %c0_12], %14 {strides = array<i32>} : memref<16x512xf32, #tpu.memory_space<vmem>>, vector<16x512xf32>,
    return
  }
  func.func @transform_0(%arg0: i32, %arg1: i32) -> (i32, i32) {
    %c0_i32 = arith.constant 0 : i32
    %c0_i32_0 = arith.constant 0 : i32
    return %arg0, %c0_i32 : i32, i32
  }
  func.func @transform_1(%arg0: i32, %arg1: i32) -> (i32, i32) {
    %c0_i32 = arith.constant 0 : i32
    %c0_i32_0 = arith.constant 0 : i32
    %c0_i32_1 = arith.constant 0 : i32
    return %c0_i32, %c0_i32_0 : i32, i32
  }
  func.func @transform_2(%arg0: i32, %arg1: i32) -> (i32, i32) {
    %c0_i32 = arith.constant 0 : i32
    %c0_i32_0 = arith.constant 0 : i32
    %c0_i32_1 = arith.constant 0 : i32
    return %c0_i32, %c0_i32_0 : i32, i32
  }
  func.func @transform_3(%arg0: i32, %arg1: i32) -> (i32, i32) {
    %c0_i32 = arith.constant 0 : i32
    %c0_i32_0 = arith.constant 0 : i32
    return %c0_i32, %arg1 : i32, i32
  }
  func.func @transform_4(%arg0: i32, %arg1: i32) -> (i32, i32) {
    %c0_i32 = arith.constant 0 : i32
    %c0_i32_0 = arith.constant 0 : i32
    return %c0_i32, %arg1 : i32, i32
  }
  func.func @transform_5(%arg0: i32, %arg1: i32) -> (i32, i32) {
    %c0_i32 = arith.constant 0 : i32
    return %arg0, %arg1 : i32, i32
  }
}

</mosaic_0001>

<bundles_post_ra>
// kernel: encoder_decoder_forward.1
= control target key start
LH: loop header
LB: loop body
LE: loop exit
PB: predicated region body
PF: predicated region fallthrough
CT: control target
= control target key end

     0   :  { %s2029_s18 = smov 0   ;;  %s2031_s19 = smov 0   ;;  %s2504_s0 = inlined_call_operand.vmem [shape: f32[16,1024], index: 0, kind: input, shape index: {}]   ;;  %s2505_s1 = inlined_call_operand.vmem [shape: bf16[1024,128], index: 1, kind: input, shape index: {}]   ;;  %s2506_s2 = inlined_call_operand.vmem [shape: f32[1,128], index: 2, kind: input, shape index: {}]   ;;  %s2507_s3 = inlined_call_operand.vmem [shape: bf16[128,1024], index: 3, kind: input, shape index: {}]   ;;  %s2508_s4 = inlined_call_operand.vmem [shape: f32[1,1024], index: 4, kind: input, shape index: {}]   ;;  %s2509_s5 = inlined_call_operand.vmem [shape: f32[16,1024], index: 5, kind: output, shape index: {}]  }
   0x1   :  { %s2033_s20 = smov 0   ;;  %s2035_s21 = smov 0  }
   0x2   :  { %s2037_s22 = smov 0  }
   0x3 LB: > { %s24_s23 = sadd.s32 1, %s1993_s21  ;;  %s1419_s24 = sadd.s32 4294967295, %s1997_s22   ;;  %s1997_s22 = sphi %s2037_s22, %s15_s22   ;;  %s1993_s21 = sphi %s2035_s21, %s2514_s21   ;;  %s1989_s20 = sphi %s2033_s20, %s2513_s20   ;;  %s1985_s19 = sphi %s2031_s19, %s2512_s19   ;;  %s1981_s18 = sphi %s2029_s18, %s2511_s18  }
   0x4   : > { %p25_p0 = scmp.ge.s32.totalorder %s24_s23, 2  ;;  %p109_p1 = scmp.ne.s32.totalorder %s1985_s19, %s1981_s18 }
   0x5   : > { %p110_p2 = scmp.eq.s32.totalorder %s1997_s22, 0  ;;  %p167_p4 = scmp.eq.s32.totalorder %s1419_s24, 1 }
   0x6   : > { %s2516_s23 = smov (%p25_p0, %s24_s23), 0  ;;  %s102_s26 = sadd.s32 1, %s1985_s19 }
   0x7   : > { %p111_p3 = por %p110_p2, %p109_p1  ;;  %s99_s25 = ssub.s32 %s1993_s21, %s2516_s23 }
   0x8   : > { %p100_p5 = scmp.eq.s32.totalorder %s99_s25, 0  ;;  %p2064_p6 = por %p167_p4, %p109_p1 }
   0x9   : > { %p1423_p7 = scmp.ge.s32.totalorder %s1997_s22, 2 }
   0xa   : > { %s2069_s28 = scalar_select %p100_p5, %s1985_s19, %s102_s26  }
   0xb   : > { %205 = sbr.rel (%p1423_p7) target bundleno = 52 (0x34), region = 28 }
  0x10   : > { %208 = sbr.rel (!%p111_p3) target bundleno = 52 (0x34), region = 32  ;;  %s210_s29 = sand.u32 (%p111_p3), 1, %s1985_s19  }
  0x11   : > { %s1820_s30 = sshll.u32 (%p111_p3), %s1993_s21, 4  ;;  %s1424_s6 = sshll.u32 (%p111_p3), %s210_s29, 8 }
  0x12   : > { %s2077_s9 = scalar_lea.vmem (%p111_p3), %s2507_s3, %s1820_s30  ;;  %s2082_s10 = scalar_lea.vmem (%p111_p3), [#allocation2], %s1424_s6 }
  0x13   : > { %v228_v0 = vld [vmem:[%s2077_s9] sm:$0xff] (%p111_p3)  ;;  %v230_v1 = vld [vmem:[%s2077_s9 + $0x8] sm:$0xff] (%p111_p3) }
  0x14   : > { %v232_v2 = vld [vmem:[%s2077_s9 + $0x20] sm:$0xff] (%p111_p3)  ;;  %229 = vst [vmem:[%s2082_s10] sm:$0xff] (%p111_p3), %v228_v0  ;;  %v234_v3 = vld [vmem:[%s2077_s9 + $0x28] sm:$0xff] (%p111_p3) }
  0x15   : > { %231 = vst [vmem:[%s2082_s10 + $0x8] sm:$0xff] %v230_v1  ;;  %v236_v4 = vld [vmem:[%s2077_s9 + $0x40] sm:$0xff]  ;;  %v238_v5 = vld [vmem:[%s2077_s9 + $0x48] sm:$0xff] }
  0x16   : > { %233 = vst [vmem:[%s2082_s10 + $0x10] sm:$0xff] %v232_v2  ;;  %v240_v6 = vld [vmem:[%s2077_s9 + $0x60] sm:$0xff]  ;;  %v242_v7 = vld [vmem:[%s2077_s9 + $0x68] sm:$0xff] }
  0x17   : > { %235 = vst [vmem:[%s2082_s10 + $0x18] sm:$0xff] %v234_v3  ;;  %v244_v8 = vld [vmem:[%s2077_s9 + $0x80] sm:$0xff]  ;;  %v246_v9 = vld [vmem:[%s2077_s9 + $0x88] sm:$0xff] }
  0x18   : > { %237 = vst [vmem:[%s2082_s10 + $0x20] sm:$0xff] %v236_v4  ;;  %v248_v10 = vld [vmem:[%s2077_s9 + $0xa0] sm:$0xff]  ;;  %v250_v11 = vld [vmem:[%s2077_s9 + $0xa8] sm:$0xff] }
  0x19   : > { %239 = vst [vmem:[%s2082_s10 + $0x28] sm:$0xff] %v238_v5  ;;  %v252_v12 = vld [vmem:[%s2077_s9 + $0xc0] sm:$0xff]  ;;  %v254_v13 = vld [vmem:[%s2077_s9 + $0xc8] sm:$0xff] }
  0x1a   : > { %241 = vst [vmem:[%s2082_s10 + $0x30] sm:$0xff] %v240_v6  ;;  %v256_v14 = vld [vmem:[%s2077_s9 + $0xe0] sm:$0xff]  ;;  %v258_v15 = vld [vmem:[%s2077_s9 + $0xe8] sm:$0xff] }
  0x1b   : > { %243 = vst [vmem:[%s2082_s10 + $0x38] sm:$0xff] %v242_v7  ;;  %v260_v16 = vld [vmem:[%s2077_s9 + $0x100] sm:$0xff]  ;;  %v262_v17 = vld [vmem:[%s2077_s9 + $0x108] sm:$0xff] }
  0x1c   : > { %245 = vst [vmem:[%s2082_s10 + $0x40] sm:$0xff] %v244_v8  ;;  %v264_v18 = vld [vmem:[%s2077_s9 + $0x120] sm:$0xff]  ;;  %v266_v19 = vld [vmem:[%s2077_s9 + $0x128] sm:$0xff] }
  0x1d   : > { %247 = vst [vmem:[%s2082_s10 + $0x48] sm:$0xff] %v246_v9  ;;  %v268_v20 = vld [vmem:[%s2077_s9 + $0x140] sm:$0xff]  ;;  %v270_v21 = vld [vmem:[%s2077_s9 + $0x148] sm:$0xff] }
  0x1e   : > { %249 = vst [vmem:[%s2082_s10 + $0x50] sm:$0xff] %v248_v10  ;;  %v272_v22 = vld [vmem:[%s2077_s9 + $0x160] sm:$0xff]  ;;  %v274_v23 = vld [vmem:[%s2077_s9 + $0x168] sm:$0xff] }
  0x1f   : > { %251 = vst [vmem:[%s2082_s10 + $0x58] sm:$0xff] %v250_v11  ;;  %v276_v24 = vld [vmem:[%s2077_s9 + $0x180] sm:$0xff]  ;;  %v278_v25 = vld [vmem:[%s2077_s9 + $0x188] sm:$0xff] }
  0x20   : > { %253 = vst [vmem:[%s2082_s10 + $0x60] sm:$0xff] %v252_v12  ;;  %v280_v26 = vld [vmem:[%s2077_s9 + $0x1a0] sm:$0xff]  ;;  %v282_v27 = vld [vmem:[%s2077_s9 + $0x1a8] sm:$0xff] }
  0x21   : > { %255 = vst [vmem:[%s2082_s10 + $0x68] sm:$0xff] %v254_v13  ;;  %v284_v28 = vld [vmem:[%s2077_s9 + $0x1c0] sm:$0xff]  ;;  %v286_v29 = vld [vmem:[%s2077_s9 + $0x1c8] sm:$0xff] }
  0x22   : > { %257 = vst [vmem:[%s2082_s10 + $0x70] sm:$0xff] %v256_v14  ;;  %v288_v30 = vld [vmem:[%s2077_s9 + $0x1e0] sm:$0xff]  ;;  %v290_v31 = vld [vmem:[%s2077_s9 + $0x1e8] sm:$0xff] }
  0x23   : > { %259 = vst [vmem:[%s2082_s10 + $0x78] sm:$0xff] %v258_v15 }
  0x24   : > { %261 = vst [vmem:[%s2082_s10 + $0x80] sm:$0xff] %v260_v16 }
  0x25   : > { %263 = vst [vmem:[%s2082_s10 + $0x88] sm:$0xff] %v262_v17 }
  0x26   : > { %265 = vst [vmem:[%s2082_s10 + $0x90] sm:$0xff] %v264_v18 }
  0x27   : > { %267 = vst [vmem:[%s2082_s10 + $0x98] sm:$0xff] %v266_v19 }
  0x28   : > { %269 = vst [vmem:[%s2082_s10 + $0xa0] sm:$0xff] %v268_v20 }
  0x29   : > { %271 = vst [vmem:[%s2082_s10 + $0xa8] sm:$0xff] %v270_v21 }
  0x2a   : > { %273 = vst [vmem:[%s2082_s10 + $0xb0] sm:$0xff] %v272_v22 }
  0x2b   : > { %275 = vst [vmem:[%s2082_s10 + $0xb8] sm:$0xff] %v274_v23 }
  0x2c   : > { %277 = vst [vmem:[%s2082_s10 + $0xc0] sm:$0xff] %v276_v24 }
  0x2d   : > { %279 = vst [vmem:[%s2082_s10 + $0xc8] sm:$0xff] %v278_v25 }
  0x2e   : > { %281 = vst [vmem:[%s2082_s10 + $0xd0] sm:$0xff] %v280_v26 }
  0x2f   : > { %283 = vst [vmem:[%s2082_s10 + $0xd8] sm:$0xff] %v282_v27 }
  0x30   : > { %285 = vst [vmem:[%s2082_s10 + $0xe0] sm:$0xff] %v284_v28 }
  0x31   : > { %287 = vst [vmem:[%s2082_s10 + $0xe8] sm:$0xff] %v286_v29 }
  0x32   : > { %289 = vst [vmem:[%s2082_s10 + $0xf0] sm:$0xff] %v288_v30 }
  0x33   : > { %291 = vst [vmem:[%s2082_s10 + $0xf8] sm:$0xff] %v290_v31 }
  0x34 PF: > { %p1427_p8 = scmp.ge.s32.totalorder %s1997_s22, 1  ;;  %p304_p9 = scmp.lt.s32.totalorder %s1997_s22, 3 }
  0x36   : > { %p305_p10 = pnand %p1427_p8, %p304_p9 }
  0x37   : > { %s311_s24 = sand.u32 (!%p305_p10), 1, %s1981_s18   ;;  %s1430_s6 = sshll.u32 (!%p305_p10), %s1989_s20, 2 }
  0x38   : > { %308 = sbr.rel (%p305_p10) target bundleno = 428 (0x1ac), region = 59  ;;  %s1428_s25 = sshll.u32 (!%p305_p10), %s311_s24, 8 }
  0x39   : > { %s2390_s26 = scalar_lea.vmem (!%p305_p10), [#allocation2], %s1428_s25  ;;  %p356_p11 = scmp.lt.s32.totalorder (!%p305_p10), %s1430_s6, 7 }
  0x3a   : > { %s1429_s10 = sshll.u32 (!%p305_p10), %s311_s24, 6 }
  0x3b   : > { %s2465_s11 = scalar_lea.vmem (!%p305_p10), [#allocation3], %s1429_s10 }
  0x3d   : > { %v1828_v32 = vld [vmem:[%s2505_s1 + $0x38] sm:$0xff]  ;;  %v1827_v36 = vld [vmem:[%s2505_s1 + $0x30] sm:$0xff]  ;;  %v1826_v40 = vld [vmem:[%s2505_s1 + $0x28] sm:$0xff]  ;;  %s2518_s6 = smov (!%p356_p11, %s1430_s6), 7  ;;  %s1917_s18 = sshll.u32 (%p2064_p6), %s1989_s20, 5 }
  0x3e   : > { %v1836_v33 = vld [vmem:[%s2505_s1 + $0x78] sm:$0xff]  ;;  %902 = vmatpush.bf16.msra.mxu0 %v1828_v32  ;;  %v1835_v37 = vld [vmem:[%s2505_s1 + $0x70] sm:$0xff]  ;;  %v1834_v41 = vld [vmem:[%s2505_s1 + $0x68] sm:$0xff]  ;;  %s358_s9 = scalar_lea.vmem %s2508_s4, %s2518_s6  ;;  %s1295_s14 = scalar_lea.vmem (%p2064_p6), %s2509_s5, %s1917_s18 }
  0x3f   : > { %v1844_v34 = vld [vmem:[%s2505_s1 + $0xb8] sm:$0xff]  ;;  %916 = vmatpush.bf16.msra.mxu1 %v1836_v33  ;;  %v1843_v38 = vld [vmem:[%s2505_s1 + $0xb0] sm:$0xff]  ;;  %v1842_v42 = vld [vmem:[%s2505_s1 + $0xa8] sm:$0xff] }
  0x40   : > { %v1852_v35 = vld [vmem:[%s2505_s1 + $0xf8] sm:$0xff]  ;;  %930 = vmatpush.bf16.msra.mxu2 %v1844_v34  ;;  %v1851_v39 = vld [vmem:[%s2505_s1 + $0xf0] sm:$0xff]  ;;  %v1850_v43 = vld [vmem:[%s2505_s1 + $0xe8] sm:$0xff] }
  0x41   : > { %944 = vmatpush.bf16.msra.mxu3 %v1852_v35  ;;  %v1825_v44 = vld [vmem:[%s2505_s1 + $0x20] sm:$0xff]  ;;  %v1824_v48 = vld [vmem:[%s2505_s1 + $0x18] sm:$0xff]  ;;  %v1823_v52 = vld [vmem:[%s2505_s1 + $0x10] sm:$0xff] }
  0x42   : > { %903 = vmatpush.bf16.msra.mxu0 %v1827_v36  ;;  %v1833_v45 = vld [vmem:[%s2505_s1 + $0x60] sm:$0xff]  ;;  %v1832_v49 = vld [vmem:[%s2505_s1 + $0x58] sm:$0xff]  ;;  %v1831_v53 = vld [vmem:[%s2505_s1 + $0x50] sm:$0xff] }
  0x43   : > { %917 = vmatpush.bf16.msra.mxu1 %v1835_v37  ;;  %v1841_v46 = vld [vmem:[%s2505_s1 + $0xa0] sm:$0xff]  ;;  %v1840_v50 = vld [vmem:[%s2505_s1 + $0x98] sm:$0xff]  ;;  %v1839_v54 = vld [vmem:[%s2505_s1 + $0x90] sm:$0xff] }
  0x44   : > { %931 = vmatpush.bf16.msra.mxu2 %v1843_v38  ;;  %v1849_v47 = vld [vmem:[%s2505_s1 + $0xe0] sm:$0xff]  ;;  %v1848_v51 = vld [vmem:[%s2505_s1 + $0xd8] sm:$0xff]  ;;  %v1847_v55 = vld [vmem:[%s2505_s1 + $0xd0] sm:$0xff] }
  0x45   : > { %945 = vmatpush.bf16.msra.mxu3 %v1851_v39  ;;  %v1822_v56 = vld [vmem:[%s2505_s1 + $0x8] sm:$0xff]  ;;  %v1821_v60 = vld [vmem:[%s2505_s1] sm:$0xff]  ;;  %v1860_v0 = vld [vmem:[%s2505_s1 + $0x138] sm:$0xff] }
  0x46   : > { %904 = vmatpush.bf16.msra.mxu0 %v1826_v40  ;;  %v1830_v57 = vld [vmem:[%s2505_s1 + $0x48] sm:$0xff]  ;;  %v1829_v61 = vld [vmem:[%s2505_s1 + $0x40] sm:$0xff]  ;;  %v1868_v1 = vld [vmem:[%s2505_s1 + $0x178] sm:$0xff] }
  0x47   : > { %918 = vmatpush.bf16.msra.mxu1 %v1834_v41  ;;  %v1838_v58 = vld [vmem:[%s2505_s1 + $0x88] sm:$0xff]  ;;  %v1837_v62 = vld [vmem:[%s2505_s1 + $0x80] sm:$0xff]  ;;  %v364_v2 = vld [vmem:[%s2504_s0 + $0x10] sm:$0xff] }
  0x48   : > { %932 = vmatpush.bf16.msra.mxu2 %v1842_v42  ;;  %v1846_v59 = vld [vmem:[%s2505_s1 + $0xc8] sm:$0xff]  ;;  %v1845_v63 = vld [vmem:[%s2505_s1 + $0xc0] sm:$0xff]  ;;  %v372_v3 = vld [vmem:[%s2504_s0 + $0x50] sm:$0xff] }
  0x49   : > { %946 = vmatpush.bf16.msra.mxu3 %v1850_v43  ;;  %v362_v4 = vld [vmem:[%s2504_s0] sm:$0xff]  ;;  %v365_v6 = vld [vmem:[%s2504_s0 + $0x18] sm:$0xff]  ;;  %v363_v8 = vld [vmem:[%s2504_s0 + $0x8] sm:$0xff]  ;;  %v380_v12 = vpack.c.bf16 %v372_v3, %v364_v2 }
  0x4a   : > { %905 = vmatpush.bf16.msra.mxu0 %v1825_v44  ;;  %v370_v5 = vld [vmem:[%s2504_s0 + $0x40] sm:$0xff]  ;;  %v373_v7 = vld [vmem:[%s2504_s0 + $0x58] sm:$0xff]  ;;  %v371_v9 = vld [vmem:[%s2504_s0 + $0x48] sm:$0xff] }
  0x4b   : > { %919 = vmatpush.bf16.msra.mxu1 %v1833_v45  ;;  %v1876_v10 = vld [vmem:[%s2505_s1 + $0x1b8] sm:$0xff]  ;;  %v378_v13 = vpack.c.bf16 %v370_v5, %v362_v4  ;;  %v381_v14 = vpack.c.bf16 %v373_v7, %v365_v6  ;;  %v379_v15 = vpack.c.bf16 %v371_v9, %v363_v8  ;;  %v1859_v16 = vld [vmem:[%s2505_s1 + $0x130] sm:$0xff]  ;;  %v1858_v20 = vld [vmem:[%s2505_s1 + $0x128] sm:$0xff] }
  0x4c   : > { %933 = vmatpush.bf16.msra.mxu2 %v1841_v46  ;;  %v1884_v11 = vld [vmem:[%s2505_s1 + $0x1f8] sm:$0xff]  ;;  %v1867_v17 = vld [vmem:[%s2505_s1 + $0x170] sm:$0xff]  ;;  %v1866_v21 = vld [vmem:[%s2505_s1 + $0x168] sm:$0xff] }
  0x4d   : > { %947 = vmatpush.bf16.msra.mxu3 %v1849_v47  ;;  %v1875_v18 = vld [vmem:[%s2505_s1 + $0x1b0] sm:$0xff]  ;;  %v1874_v22 = vld [vmem:[%s2505_s1 + $0x1a8] sm:$0xff]  ;;  %v1857_v24 = vld [vmem:[%s2505_s1 + $0x120] sm:$0xff] }
  0x4e   : > { %906 = vmatpush.bf16.msra.mxu0 %v1824_v48  ;;  %v1883_v19 = vld [vmem:[%s2505_s1 + $0x1f0] sm:$0xff]  ;;  %v1882_v23 = vld [vmem:[%s2505_s1 + $0x1e8] sm:$0xff]  ;;  %v1865_v25 = vld [vmem:[%s2505_s1 + $0x160] sm:$0xff] }
  0x4f   : > { %920 = vmatpush.bf16.msra.mxu1 %v1832_v49  ;;  %v1873_v26 = vld [vmem:[%s2505_s1 + $0x1a0] sm:$0xff]  ;;  %v1856_v28 = vld [vmem:[%s2505_s1 + $0x118] sm:$0xff]  ;;  %v1855_v32 = vld [vmem:[%s2505_s1 + $0x110] sm:$0xff] }
  0x50   : > { %934 = vmatpush.bf16.msra.mxu2 %v1840_v50  ;;  %v1881_v27 = vld [vmem:[%s2505_s1 + $0x1e0] sm:$0xff]  ;;  %v1864_v29 = vld [vmem:[%s2505_s1 + $0x158] sm:$0xff]  ;;  %v1863_v33 = vld [vmem:[%s2505_s1 + $0x150] sm:$0xff] }
  0x51   : > { %948 = vmatpush.bf16.msra.mxu3 %v1848_v51  ;;  %v1872_v30 = vld [vmem:[%s2505_s1 + $0x198] sm:$0xff]  ;;  %v1871_v34 = vld [vmem:[%s2505_s1 + $0x190] sm:$0xff]  ;;  %v1854_v36 = vld [vmem:[%s2505_s1 + $0x108] sm:$0xff] }
  0x52   : > { %907 = vmatpush.bf16.msra.mxu0 %v1823_v52  ;;  %v1880_v31 = vld [vmem:[%s2505_s1 + $0x1d8] sm:$0xff]  ;;  %v1879_v35 = vld [vmem:[%s2505_s1 + $0x1d0] sm:$0xff]  ;;  %v1862_v37 = vld [vmem:[%s2505_s1 + $0x148] sm:$0xff] }
  0x53   : > { %921 = vmatpush.bf16.msra.mxu1 %v1831_v53  ;;  %v1870_v38 = vld [vmem:[%s2505_s1 + $0x188] sm:$0xff]  ;;  %v1853_v40 = vld [vmem:[%s2505_s1 + $0x100] sm:$0xff]  ;;  %v368_v48 = vld [vmem:[%s2504_s0 + $0x30] sm:$0xff] }
  0x54   : > { %935 = vmatpush.bf16.msra.mxu2 %v1839_v54  ;;  %v1878_v39 = vld [vmem:[%s2505_s1 + $0x1c8] sm:$0xff]  ;;  %v1861_v41 = vld [vmem:[%s2505_s1 + $0x140] sm:$0xff]  ;;  %v376_v49 = vld [vmem:[%s2504_s0 + $0x70] sm:$0xff] }
  0x55   : > { %949 = vmatpush.bf16.msra.mxu3 %v1847_v55  ;;  %v1869_v42 = vld [vmem:[%s2505_s1 + $0x180] sm:$0xff]  ;;  %v367_v46 = vld [vmem:[%s2504_s0 + $0x28] sm:$0xff]  ;;  %v369_v50 = vld [vmem:[%s2504_s0 + $0x38] sm:$0xff]  ;;  %v384_v54 = vpack.c.bf16 %v376_v49, %v368_v48 }
  0x56   : > { %908 = vmatpush.bf16.msra.mxu0 %v1822_v56  ;;  %v1877_v43 = vld [vmem:[%s2505_s1 + $0x1c0] sm:$0xff]  ;;  %v375_v47 = vld [vmem:[%s2504_s0 + $0x68] sm:$0xff]  ;;  %v377_v51 = vld [vmem:[%s2504_s0 + $0x78] sm:$0xff] }
  0x57   : > { %922 = vmatpush.bf16.msra.mxu1 %v1830_v57  ;;  %v366_v44 = vld [vmem:[%s2504_s0 + $0x20] sm:$0xff]  ;;  %v383_v53 = vpack.c.bf16 %v375_v47, %v367_v46  ;;  %v385_v55 = vpack.c.bf16 %v377_v51, %v369_v50  ;;  %v1915_v57 = vld [vmem:[%s2390_s26 + $0xec] sm:$0xf0]  ;;  %v1811_v2 = vld [vmem:[%s2390_s26 + $0xf8] sm:$0xf0] }
  0x58   : > { %936 = vmatpush.bf16.msra.mxu2 %v1838_v58  ;;  %v374_v45 = vld [vmem:[%s2504_s0 + $0x60] sm:$0xff]  ;;  %v1911_v5 = vld [vmem:[%s2390_s26 + $0xcc] sm:$0xf0]  ;;  %v1787_v7 = vld [vmem:[%s2390_s26 + $0xd0] sm:$0xf0] }
  0x59   : > { %950 = vmatpush.bf16.msra.mxu3 %v1846_v59  ;;  %v382_v52 = vpack.c.bf16 %v374_v45, %v366_v44  ;;  %v1801_v56 = vld [vmem:[%s2390_s26 + $0xe0] sm:$0xf]  ;;  %v1913_v58 = vld [vmem:[%s2390_s26 + $0xe4] sm:$0xf]  ;;  %v1739_v44 = vld [vmem:[%s2390_s26 + $0x70] sm:$0xf0] }
  0x5a   : > { %909 = vmatpush.bf16.msra.mxu0 %v1821_v60  ;;  %v1802_v59 = vor.u32 %v1915_v57, %v1801_v56  ;;  %v1803_v60 = vld [vmem:[%s2390_s26 + $0xf0] sm:$0xf0]  ;;  %v1785_v3 = vld [vmem:[%s2390_s26 + $0xc0] sm:$0xf]  ;;  %v1909_v6 = vld [vmem:[%s2390_s26 + $0xc4] sm:$0xf] }
  0x5b   : > { %923 = vmatpush.bf16.msra.mxu1 %v1829_v61  ;;  %v1809_v61 = vld [vmem:[%s2390_s26 + $0xe8] sm:$0xf]  ;;  %v1786_v8 = vor.u32 %v1911_v5, %v1785_v3  ;;  %v1790_v9 = vor.u32 %v1909_v6, %v1787_v7  ;;  %v1900_v46 = vld [vmem:[%s2390_s26 + $0x74] sm:$0xf0]  ;;  %v1898_v49 = vld [vmem:[%s2390_s26 + $0x6c] sm:$0xf] }
  0x5c   : > { %937 = vmatpush.bf16.msra.mxu2 %v1837_v62  ;;  %v1916_v62 = vld [vmem:[%s2390_s26 + $0xf4] sm:$0xf0]  ;;  %v1745_v45 = vld [vmem:[%s2390_s26 + $0x68] sm:$0xf]  ;;  %v1747_v50 = vld [vmem:[%s2390_s26 + $0x78] sm:$0xf0] }
  0x5d   : > { %951 = vmatpush.bf16.msra.mxu3 %v1845_v63  ;;  %910 = vmatmul.bf16.vlgmr.msra.gmra.mxu0 %v378_v13  ;;  %v1806_v63 = vor.u32 %v1913_v58, %v1803_v60  ;;  %v1746_v48 = vor.u32 %v1900_v46, %v1745_v45  ;;  %v1750_v51 = vor.u32 %v1898_v49, %v1747_v50  ;;  %v1723_v56 = vld [vmem:[%s2390_s26 + $0x50] sm:$0xf0]  ;;  %v1729_v57 = vld [vmem:[%s2390_s26 + $0x48] sm:$0xf]  ;;  %v1896_v58 = vld [vmem:[%s2390_s26 + $0x54] sm:$0xf0] }
  0x5e   : > { %958 = vmatpush.bf16.msrb.mxu0 %v1860_v0  ;;  %924 = vmatmul.bf16.vlgmr.msra.gmra.mxu1 %v379_v15  ;;  %v1810_v0 = vor.u32 %v1916_v62, %v1809_v61  ;;  %v1730_v60 = vor.u32 %v1896_v58, %v1729_v57  ;;  %v1894_v61 = vld [vmem:[%s2390_s26 + $0x4c] sm:$0xf]  ;;  %v1731_v62 = vld [vmem:[%s2390_s26 + $0x58] sm:$0xf0]  ;;  %v1889_v3 = vld [vmem:[%s2390_s26 + $0x24] sm:$0xf] }
  0x5f   : > { %972 = vmatpush.bf16.msrb.mxu1 %v1868_v1  ;;  %938 = vmatmul.bf16.vlgmr.msra.gmra.mxu2 %v380_v12  ;;  %v1914_v1 = vld [vmem:[%s2390_s26 + $0xec] sm:$0xf]  ;;  %v1707_v5 = vld [vmem:[%s2390_s26 + $0x30] sm:$0xf0]  ;;  %v1713_v6 = vld [vmem:[%s2390_s26 + $0x28] sm:$0xf] }
  0x60   : > { %986 = vmatpush.bf16.msrb.mxu2 %v1876_v10  ;;  %952 = vmatmul.bf16.vlgmr.msra.gmra.mxu3 %v381_v14  ;;  %v1814_v4 = vor.u32 %v1914_v1, %v1811_v2  ;;  %v1793_v10 = vld [vmem:[%s2390_s26 + $0xc8] sm:$0xf]  ;;  %v1910_v12 = vld [vmem:[%s2390_s26 + $0xcc] sm:$0xf]  ;;  %v1795_v14 = vld [vmem:[%s2390_s26 + $0xd8] sm:$0xf0] }
  0x61   : > { %1000 = vmatpush.bf16.msrb.mxu3 %v1884_v11  ;;  %v1912_v11 = vld [vmem:[%s2390_s26 + $0xd4] sm:$0xf0]  ;;  %v1798_v15 = vor.u32 %v1910_v12, %v1795_v14  ;;  %v1705_v1 = vld [vmem:[%s2390_s26 + $0x20] sm:$0xf]  ;;  %v1891_v2 = vld [vmem:[%s2390_s26 + $0x2c] sm:$0xf0] }
  0x62   : > { %959 = vmatpush.bf16.msrb.mxu0 %v1859_v16  ;;  %v1794_v13 = vor.u32 %v1912_v11, %v1793_v10  ;;  %v1769_v16 = vld [vmem:[%s2390_s26 + $0xa0] sm:$0xf]  ;;  %v1892_v7 = vld [vmem:[%s2390_s26 + $0x34] sm:$0xf0]  ;;  %v1890_v10 = vld [vmem:[%s2390_s26 + $0x2c] sm:$0xf] }
  0x63   : > { %973 = vmatpush.bf16.msrb.mxu1 %v1867_v17  ;;  %v1907_v17 = vld [vmem:[%s2390_s26 + $0xac] sm:$0xf0]  ;;  %v1715_v11 = vld [vmem:[%s2390_s26 + $0x38] sm:$0xf0]  ;;  %v1689_v14 = vld [vmem:[%s2390_s26] sm:$0xf] }
  0x64   : > { %987 = vmatpush.bf16.msrb.mxu2 %v1875_v18  ;;  %v1905_v18 = vld [vmem:[%s2390_s26 + $0xa4] sm:$0xf] }
  0x65   : > { %1001 = vmatpush.bf16.msrb.mxu3 %v1883_v19  ;;  %v1770_v19 = vor.u32 %v1907_v17, %v1769_v16  ;;  %v1885_v16 = vld [vmem:[%s2390_s26 + $0x4] sm:$0xf] }
  0x66   : > { %960 = vmatpush.bf16.msrb.mxu0 %v1858_v20  ;;  %v1771_v20 = vld [vmem:[%s2390_s26 + $0xb0] sm:$0xf0] }
  0x67   : > { %974 = vmatpush.bf16.msrb.mxu1 %v1866_v21  ;;  %v1777_v21 = vld [vmem:[%s2390_s26 + $0xa8] sm:$0xf] }
  0x68   : > { %988 = vmatpush.bf16.msrb.mxu2 %v1874_v22  ;;  %v1908_v22 = vld [vmem:[%s2390_s26 + $0xb4] sm:$0xf0] }
  0x69   : > { %1002 = vmatpush.bf16.msrb.mxu3 %v1882_v23  ;;  %v1774_v23 = vor.u32 %v1905_v18, %v1771_v20  ;;  %v1691_v18 = vld [vmem:[%s2390_s26 + $0x10] sm:$0xf0]  ;;  %v1888_v20 = vld [vmem:[%s2390_s26 + $0x14] sm:$0xf0] }
  0x6a   : > { %961 = vmatpush.bf16.msrb.mxu0 %v1857_v24  ;;  %v1778_v24 = vor.u32 %v1908_v22, %v1777_v21  ;;  %v1958_v21 = vld [vmem:[%s2506_s2] ss:$0 sm:$0xff]  ;;  %v1694_v22 = vor.u32 %v1885_v16, %v1691_v18 }
  0x6b   : > { %975 = vmatpush.bf16.msrb.mxu1 %v1865_v25  ;;  %v1906_v25 = vld [vmem:[%s2390_s26 + $0xac] sm:$0xf] }
  0x6c   : > { %989 = vmatpush.bf16.msrb.mxu2 %v1873_v26  ;;  %v1779_v26 = vld [vmem:[%s2390_s26 + $0xb8] sm:$0xf0] }
  0x6d   : > { %1003 = vmatpush.bf16.msrb.mxu3 %v1881_v27  ;;  %v1782_v27 = vor.u32 %v1906_v25, %v1779_v26  ;;  %v1699_v25 = vld [vmem:[%s2390_s26 + $0x18] sm:$0xf0] }
  0x6e   : > { %962 = vmatpush.bf16.msrb.mxu0 %v1856_v28  ;;  %v1753_v28 = vld [vmem:[%s2390_s26 + $0x80] sm:$0xf] }
  0x6f   : > { %976 = vmatpush.bf16.msrb.mxu1 %v1864_v29  ;;  %v1903_v29 = vld [vmem:[%s2390_s26 + $0x8c] sm:$0xf0] }
  0x70   : > { %990 = vmatpush.bf16.msrb.mxu2 %v1872_v30  ;;  %v1901_v30 = vld [vmem:[%s2390_s26 + $0x84] sm:$0xf] }
  0x71   : > { %1004 = vmatpush.bf16.msrb.mxu3 %v1880_v31  ;;  %v1754_v31 = vor.u32 %v1903_v29, %v1753_v28 }
  0x72   : > { %963 = vmatpush.bf16.msrb.mxu0 %v1855_v32  ;;  %v1755_v32 = vld [vmem:[%s2390_s26 + $0x90] sm:$0xf0] }
  0x73   : > { %977 = vmatpush.bf16.msrb.mxu1 %v1863_v33  ;;  %v1761_v33 = vld [vmem:[%s2390_s26 + $0x88] sm:$0xf] }
  0x74   : > { %991 = vmatpush.bf16.msrb.mxu2 %v1871_v34  ;;  %v1904_v34 = vld [vmem:[%s2390_s26 + $0x94] sm:$0xf0] }
  0x75   : > { %1005 = vmatpush.bf16.msrb.mxu3 %v1879_v35  ;;  %v1758_v35 = vor.u32 %v1901_v30, %v1755_v32 }
  0x76   : > { %964 = vmatpush.bf16.msrb.mxu0 %v1854_v36  ;;  %v1762_v36 = vor.u32 %v1904_v34, %v1761_v33 }
  0x77   : > { %978 = vmatpush.bf16.msrb.mxu1 %v1862_v37  ;;  %v1902_v37 = vld [vmem:[%s2390_s26 + $0x8c] sm:$0xf] }
  0x78   : > { %992 = vmatpush.bf16.msrb.mxu2 %v1870_v38  ;;  %v1763_v38 = vld [vmem:[%s2390_s26 + $0x98] sm:$0xf0] }
  0x79   : > { %1006 = vmatpush.bf16.msrb.mxu3 %v1878_v39  ;;  %v1766_v39 = vor.u32 %v1902_v37, %v1763_v38 }
  0x7a   : > { %965 = vmatpush.bf16.msrb.mxu0 %v1853_v40  ;;  %v1737_v40 = vld [vmem:[%s2390_s26 + $0x60] sm:$0xf] }
  0x7b   : > { %979 = vmatpush.bf16.msrb.mxu1 %v1861_v41  ;;  %v1899_v41 = vld [vmem:[%s2390_s26 + $0x6c] sm:$0xf0] }
  0x7c   : > { %993 = vmatpush.bf16.msrb.mxu2 %v1869_v42  ;;  %v1897_v42 = vld [vmem:[%s2390_s26 + $0x64] sm:$0xf] }
  0x7d   : > { %1007 = vmatpush.bf16.msrb.mxu3 %v1877_v43  ;;  %966 = vmatmul.bf16.vlgmr.msrb.gmra.mxu0 %v382_v52  ;;  %v1738_v43 = vor.u32 %v1899_v41, %v1737_v40  ;;  %v1742_v47 = vor.u32 %v1897_v42, %v1739_v44  ;;  %v1721_v52 = vld [vmem:[%s2390_s26 + $0x40] sm:$0xf] }
  0x7e   : > { %980 = vmatmul.bf16.vlgmr.msrb.gmra.mxu1 %v383_v53  ;;  %1219 = vmatpush.bf16.msra.mxu0 %v1802_v59  ;;  %v1895_v53 = vld [vmem:[%s2390_s26 + $0x4c] sm:$0xf0] }
  0x7f   : > { %994 = vmatmul.bf16.vlgmr.msrb.gmra.mxu2 %v384_v54  ;;  %1233 = vmatpush.bf16.msra.mxu1 %v1806_v63  ;;  %v1893_v54 = vld [vmem:[%s2390_s26 + $0x44] sm:$0xf]  ;;  %v1734_v63 = vor.u32 %v1894_v61, %v1731_v62 }
  0x80   : > { %1008 = vmatmul.bf16.vlgmr.msrb.gmra.mxu3 %v385_v55  ;;  %1247 = vmatpush.bf16.msra.mxu2 %v1810_v0  ;;  %v1722_v55 = vor.u32 %v1895_v53, %v1721_v52  ;;  %v1726_v59 = vor.u32 %v1893_v54, %v1723_v56 }
  0x81   : > { %1261 = vmatpush.bf16.msra.mxu3 %v1814_v4  ;;  %v1706_v4 = vor.u32 %v1891_v2, %v1705_v1 }
  0x82   : > { %1220 = vmatpush.bf16.msra.mxu0 %v1786_v8  ;;  %v1710_v8 = vor.u32 %v1889_v3, %v1707_v5 }
  0x83   : > { %1234 = vmatpush.bf16.msra.mxu1 %v1790_v9  ;;  %v1714_v9 = vor.u32 %v1892_v7, %v1713_v6 }
  0x84   : > { %1248 = vmatpush.bf16.msra.mxu2 %v1794_v13  ;;  %v1718_v13 = vor.u32 %v1890_v10, %v1715_v11 }
  0x85   : > { %1262 = vmatpush.bf16.msra.mxu3 %v1798_v15  ;;  %v1887_v15 = vld [vmem:[%s2390_s26 + $0xc] sm:$0xf0] }
  0x86   : > { %1221 = vmatpush.bf16.msra.mxu0 %v1770_v19  ;;  %v1690_v17 = vor.u32 %v1887_v15, %v1689_v14  ;;  %v1697_v19 = vld [vmem:[%s2390_s26 + $0x8] sm:$0xf] }
  0x87   : > { %1235 = vmatpush.bf16.msra.mxu1 %v1774_v23  ;;  %v1698_v23 = vor.u32 %v1888_v20, %v1697_v19 }
  0x88   : > { %1249 = vmatpush.bf16.msra.mxu2 %v1778_v24  ;;  %v1886_v24 = vld [vmem:[%s2390_s26 + $0xc] sm:$0xf] }
  0x89   : > { %1263 = vmatpush.bf16.msra.mxu3 %v1782_v27  ;;  %v1702_v28 = vor.u32 %v1886_v24, %v1699_v25 }
  0x8a   : > { %1222 = vmatpush.bf16.msra.mxu0 %v1754_v31 }
  0x8b   : > { %1236 = vmatpush.bf16.msra.mxu1 %v1758_v35 }
  0x8c   : > { %1250 = vmatpush.bf16.msra.mxu2 %v1762_v36 }
  0x8d   : > { %1264 = vmatpush.bf16.msra.mxu3 %v1766_v39 }
  0x8e   : > { %1223 = vmatpush.bf16.msra.mxu0 %v1738_v43 }
  0x8f   : > { %1237 = vmatpush.bf16.msra.mxu1 %v1742_v47 }
  0x90   : > { %1251 = vmatpush.bf16.msra.mxu2 %v1746_v48 }
  0x91   : > { %1265 = vmatpush.bf16.msra.mxu3 %v1750_v51 }
  0x92   : > { %1224 = vmatpush.bf16.msra.mxu0 %v1722_v55 }
  0x93   : > { %1238 = vmatpush.bf16.msra.mxu1 %v1726_v59 }
  0x94   : > { %1252 = vmatpush.bf16.msra.mxu2 %v1730_v60  ;;  %v1049_v60 = vld [vmem:[%s358_s9] sm:$0xf] }
  0x95   : > { %1266 = vmatpush.bf16.msra.mxu3 %v1734_v63  ;;  %v1051_v61 = vperm.slane %v1049_v60, 0  ;;  %v1052_v62 = vperm.slane %v1049_v60, 1  ;;  %v1053_v3 = vperm.slane %v1049_v60, 2 }
  0x96   : > { %1225 = vmatpush.bf16.msra.mxu0 %v1706_v4  ;;  %v1054_v4 = vperm.slane %v1049_v60, 3 }
  0x97   : > { %1239 = vmatpush.bf16.msra.mxu1 %v1710_v8 }
  0x98   : > { %1253 = vmatpush.bf16.msra.mxu2 %v1714_v9 }
  0x99   : > { %1267 = vmatpush.bf16.msra.mxu3 %v1718_v13 }
  0x9a   : > { %1226 = vmatpush.bf16.msra.mxu0 %v1690_v17 }
  0x9b   : > { %1240 = vmatpush.bf16.msra.mxu1 %v1694_v22 }
  0x9c   : > { %1254 = vmatpush.bf16.msra.mxu2 %v1698_v23 }
  0x9d   : > { %1268 = vmatpush.bf16.msra.mxu3 %v1702_v28 }
  0xda   : > { %v911_v0 = vpop.f32.mrf.mxu0 }
  0xdb   : > { %v925_v12 = vpop.f32.mrf.mxu1  ;;  %v912_v29 = vadd.f32 %v1958_v21, %v911_v0 }
  0xdd   : > { %v926_v32 = vadd.f32 %v925_v12, %v912_v29 }
  0xe2   : > { %v939_v26 = vpop.f32.mrf.mxu2  ;;  %v913_v30 = vpop.f32.mrf.mxu0 }
  0xe3   : > { %v953_v27 = vpop.f32.mrf.mxu3  ;;  %v927_v31 = vpop.f32.mrf.mxu1  ;;  %v914_v33 = vadd.f32 %v1958_v21, %v913_v30  ;;  %v940_v36 = vadd.f32 %v939_v26, %v926_v32 }
  0xe5   : > { %v928_v37 = vadd.f32 %v927_v31, %v914_v33  ;;  %v954_v40 = vadd.f32 %v953_v27, %v940_v36 }
  0xea   : > { %v941_v34 = vpop.f32.mrf.mxu2 }
  0xeb   : > { %v955_v35 = vpop.f32.mrf.mxu3  ;;  %v942_v41 = vadd.f32 %v941_v34, %v928_v37 }
  0xed   : > { %v956_v45 = vadd.f32 %v955_v35, %v942_v41 }
  0xfa   : > { %v967_v38 = vpop.f32.mrf.mxu0 }
  0xfb   : > { %v981_v39 = vpop.f32.mrf.mxu1  ;;  %v968_v42 = vadd.f32 %v967_v38, %v954_v40 }
  0xfd   : > { %v982_v47 = vadd.f32 %v981_v39, %v968_v42 }
 0x102   : > { %v995_v43 = vpop.f32.mrf.mxu2  ;;  %v969_v46 = vpop.f32.mrf.mxu0 }
 0x103   : > { %v1009_v44 = vpop.f32.mrf.mxu3  ;;  %v970_v48 = vadd.f32 %v969_v46, %v956_v45  ;;  %v996_v49 = vadd.f32 %v995_v43, %v982_v47  ;;  %v983_v50 = vpop.f32.mrf.mxu1 }
 0x105   : > { %v984_v51 = vadd.f32 %v983_v50, %v970_v48  ;;  %v1010_v53 = vadd.f32 %v1009_v44, %v996_v49 }
 0x107   : > { %v1014_v57 = vmax.f32 %v1010_v53, 0.0 }
 0x10a   : > { %v997_v52 = vpop.f32.mrf.mxu2 }
 0x10b   : > { %v998_v54 = vadd.f32 %v997_v52, %v984_v51  ;;  %v1011_v55 = vpop.f32.mrf.mxu3 }
 0x10d   : > { %v1012_v56 = vadd.f32 %v1011_v55, %v998_v54 }
 0x10f   : > { %v1015_v58 = vmax.f32 %v1012_v56, 0.0 }
 0x111   : > { %v1016_v59 = vpack.c.bf16 %v1015_v58, %v1014_v57 }
 0x113   : > { %1227 = vmatmul.bf16.vlgmr.msra.gmra.mxu0 %v1016_v59  ;;  %1241 = vmatmul.bf16.vlgmr.msra.gmra.mxu1 %v1016_v59 }
 0x114   : > { %1255 = vmatmul.bf16.vlgmr.msra.gmra.mxu2 %v1016_v59  ;;  %1269 = vmatmul.bf16.vlgmr.msra.gmra.mxu3 %v1016_v59 }
 0x190   : > { %v1228_v63 = vpop.f32.mrf.mxu0  ;;  %v1242_v0 = vpop.f32.mrf.mxu1 }
 0x191   : > { %v1229_v1 = vadd.f32 %v1228_v63, %v1051_v61  ;;  %v1243_v2 = vadd.f32 %v1242_v0, %v1052_v62 }
 0x193   : > { %1275 = vst [vmem:[%s2465_s11] sm:$0xff] %v1229_v1 }
 0x194   : > { %1276 = vst [vmem:[%s2465_s11 + $0x8] sm:$0xff] %v1243_v2 }
 0x197   : > { %v1256_v5 = vpop.f32.mrf.mxu2  ;;  %v1270_v6 = vpop.f32.mrf.mxu3 }
 0x198   : > { %v1257_v7 = vadd.f32 %v1256_v5, %v1053_v3  ;;  %v1271_v8 = vadd.f32 %v1270_v6, %v1054_v4  ;;  %v1230_v9 = vpop.f32.mrf.mxu0  ;;  %v1244_v10 = vpop.f32.mrf.mxu1 }
 0x199   : > { %v1231_v11 = vadd.f32 %v1230_v9, %v1051_v61  ;;  %v1245_v12 = vadd.f32 %v1244_v10, %v1052_v62 }
 0x19a   : > { %1277 = vst [vmem:[%s2465_s11 + $0x10] sm:$0xff] %v1257_v7  ;;  %v1308_v17 = vld [vmem:[%s2465_s11] sm:$0xff] (%p2064_p6) }
 0x19b   : > { %1278 = vst [vmem:[%s2465_s11 + $0x18] sm:$0xff] %v1271_v8  ;;  %v1310_v18 = vld [vmem:[%s2465_s11 + $0x8] sm:$0xff] (%p2064_p6) }
 0x19c   : > { %1279 = vst [vmem:[%s2465_s11 + $0x20] sm:$0xff] %v1231_v11 }
 0x19d   : > { %1280 = vst [vmem:[%s2465_s11 + $0x28] sm:$0xff] %v1245_v12 }
 0x19e   : > { %1309 = vst [vmem:[%s1295_s14] sm:$0xff] (%p2064_p6), %v1308_v17 }
 0x19f   : > { %v1258_v13 = vpop.f32.mrf.mxu2  ;;  %v1272_v14 = vpop.f32.mrf.mxu3  ;;  %1289 = sbr.rel (!%p2064_p6) target bundleno = 428 (0x1ac), region = 67  ;;  %1311 = vst [vmem:[%s1295_s14 + $0x8] sm:$0xff] (%p2064_p6), %v1310_v18 }
 0x1a0   : > { %v1259_v15 = vadd.f32 %v1258_v13, %v1053_v3  ;;  %v1273_v16 = vadd.f32 %v1272_v14, %v1054_v4 }
 0x1a1   : > { %v1312_v19 = vld [vmem:[%s2465_s11 + $0x10] sm:$0xff] (%p2064_p6) }
 0x1a2   : > { %1281 = vst [vmem:[%s2465_s11 + $0x30] sm:$0xff] %v1259_v15  ;;  %v1314_v20 = vld [vmem:[%s2465_s11 + $0x18] sm:$0xff] (%p2064_p6) }
 0x1a3   : > { %1282 = vst [vmem:[%s2465_s11 + $0x38] sm:$0xff] %v1273_v16  ;;  %v1316_v21 = vld [vmem:[%s2465_s11 + $0x20] sm:$0xff] (%p2064_p6) }
 0x1a4   : > { %1313 = vst [vmem:[%s1295_s14 + $0x10] sm:$0xff] %v1312_v19  ;;  %v1318_v22 = vld [vmem:[%s2465_s11 + $0x28] sm:$0xff] }
 0x1a5   : > { %1315 = vst [vmem:[%s1295_s14 + $0x18] sm:$0xff] %v1314_v20 }
 0x1a6   : > { %1317 = vst [vmem:[%s1295_s14 + $0x40] sm:$0xff] %v1316_v21 }
 0x1a7   : > { %1319 = vst [vmem:[%s1295_s14 + $0x48] sm:$0xff] %v1318_v22 }
 0x1a9   : > { %v1320_v23 = vld [vmem:[%s2465_s11 + $0x30] sm:$0xff] }
 0x1aa   : > { %v1322_v24 = vld [vmem:[%s2465_s11 + $0x38] sm:$0xff]  ;;  %1321 = vst [vmem:[%s1295_s14 + $0x50] sm:$0xff] %v1320_v23 }
 0x1ab   : > { %1323 = vst [vmem:[%s1295_s14 + $0x58] sm:$0xff] %v1322_v24 }
 0x1ac PF: > { %s15_s22 = sadd.s32 1, %s1997_s22   ;;  %s2511_s18 = smov %s1985_s19 }
 0x1ad   : > { %p12_p12 = scmp.ge.s32.totalorder %s15_s22, 4   ;;  %s2512_s19 = smov %s2069_s28 }
 0x1ae   : > { %s2513_s20 = smov %s1993_s21  ;;  %s2514_s21 = smov %s2516_s23 }
 0x1af   :  { %14 = sbr.rel (!%p12_p12) target bundleno = 3 (0x3), region = 127 }

</bundles_post_ra>
